<compile_context>
chip_gen: v7x
topology: tpu7x:2x2x1
jax: 0.10.0
libtpu: 0.0.40
codegen_flags: <defaults>
</compile_context>

<pallas_src>
import functools

import jax
import jax.numpy as jnp
from jax.experimental import pallas as pl
from jax.experimental.pallas import tpu as pltpu

_LANES = 128      # lane width (last-dim alignment target)
_SUBLANES = 8     # f32 sublane count (second-to-last-dim alignment target)


def _round_up(x, m):
    return ((x + m - 1) // m) * m


def _device_kind():
    try:
        return jax.devices()[0].device_kind.lower().replace(" ", "")
    except Exception:
        return ""


def _tc_count():
    # v7x has 2 TensorCores per chip; v5e/v6e have 1.
    k = _device_kind()
    return 2 if ("v7" in k or "tpu7" in k) else 1


def _bf16_tanh_ok():
    # bf16 VPU/EUP exist on v6e/v7x; v5e (and older) keep the tanh chain in f32.
    k = _device_kind()
    return any(t in k for t in ("v6", "tpu6", "v7", "tpu7"))


# ---------------------------------------------------------------------------
# Kernel
# ---------------------------------------------------------------------------
def _policy_kernel(
    x_ref,                       # [TM, obs_dim]  f32
    w1_ref, b1_ref,              # shared layer 1: obs_dim -> hidden   (bf16 / f32)
    w2_ref, b2_ref,              # shared layer 2: hidden  -> hidden   (bf16 / f32)
    wh1_ref, bh1_ref,            # fused heads 1:  hidden  -> 2*hidden (actor || critic)
    wh2_ref, bh2_ref,            # fused heads 2:  2*hidden -> 128 (block-diag, lane-padded)
    out_ref,                     # [TM, 128] f32 : mean in lanes [0:A], value in lane A
    *,
    bf16_tanh,
):
    act = jnp.bfloat16 if bf16_tanh else jnp.float32

    # bf16 operands for every MXU dot; f32 accumulation + f32 bias add.
    x = x_ref[...].astype(jnp.bfloat16)

    h = jnp.dot(x, w1_ref[...], preferred_element_type=jnp.float32) + b1_ref[...]
    h = jnp.tanh(h.astype(act)).astype(jnp.bfloat16)

    h = jnp.dot(h, w2_ref[...], preferred_element_type=jnp.float32) + b2_ref[...]
    h = jnp.tanh(h.astype(act)).astype(jnp.bfloat16)

    ac = jnp.dot(h, wh1_ref[...], preferred_element_type=jnp.float32) + bh1_ref[...]
    ac = jnp.tanh(ac.astype(act)).astype(jnp.bfloat16)

    # Block-diagonal head weight -> mean in lanes [0:A], value in lane A,
    # zeros elsewhere: one lane-dense unmasked 128-wide store.
    out_ref[...] = (
        jnp.dot(ac, wh2_ref[...], preferred_element_type=jnp.float32) + bh2_ref[...]
    )


# ---------------------------------------------------------------------------
# One-time parameter packing
# ---------------------------------------------------------------------------
def pack_params(params, *, weight_dtype=jnp.bfloat16):
    """One-time packing: fuse actor/critic heads, cast weights to bf16, hoist exp(log_std).

    Call once when parameters change, NOT per forward call.
    """
    hidden = params["w2"].shape[1]
    action_dim = params["wa2"].shape[1]
    out_pad = _round_up(action_dim + 1, _LANES)   # lane-dense output width

    # heads layer 1: concat along output features -> [H, 2H]
    wh1 = jnp.concatenate([params["wa1"], params["wc1"]], axis=1)
    bh1 = jnp.concatenate([params["ba1"], params["bc1"]], axis=1)

    # heads layer 2: block-diagonal [2H, out_pad]
    #   rows [0:H]  x cols [0:A]    = wa2   (actor mean)
    #   rows [H:2H] x cols [A:A+1]  = wc2   (critic value)
    wh2 = jnp.zeros((2 * hidden, out_pad), jnp.float32)
    wh2 = wh2.at[:hidden, :action_dim].set(params["wa2"])
    wh2 = wh2.at[hidden:, action_dim:action_dim + 1].set(params["wc2"])
    bh2 = jnp.zeros((1, out_pad), jnp.float32)
    bh2 = bh2.at[:, :action_dim].set(params["ba2"])
    bh2 = bh2.at[:, action_dim:action_dim + 1].set(params["bc2"])

    wd = weight_dtype
    return {
        "w1": params["w1"].astype(wd), "b1": params["b1"].astype(jnp.float32),
        "w2": params["w2"].astype(wd), "b2": params["b2"].astype(jnp.float32),
        "wh1": wh1.astype(wd), "bh1": bh1.astype(jnp.float32),
        "wh2": wh2.astype(wd), "bh2": bh2.astype(jnp.float32),
        # action_std = exp(log_std) is input-independent: compute it here once.
        "std": jnp.exp(params["log_std"]).reshape(-1),
        "action_dim": int(action_dim),
        "out_pad": int(out_pad),
    }


def _weight_tuple(packed):
    return (packed["w1"], packed["b1"], packed["w2"], packed["b2"],
            packed["wh1"], packed["bh1"], packed["wh2"], packed["bh2"])


# ---------------------------------------------------------------------------
# Capability probe: single-buffered resident weights (pl.Buffered(1))
# ---------------------------------------------------------------------------
_BUFFERED1_OK = None


def _probe_kernel(x_ref, o_ref):
    o_ref[...] = x_ref[...] + 1.0


def _buffered1_supported():
    """One-time eager probe: a constant-index input with pipeline_mode=pl.Buffered(1)
    must both compile and produce correct results on this jax build."""
    global _BUFFERED1_OK
    if _BUFFERED1_OK is not None:
        return _BUFFERED1_OK
    try:
        x = jnp.arange(8 * 128, dtype=jnp.float32).reshape(8, 128)
        out = pl.pallas_call(
            _probe_kernel,
            out_shape=jax.ShapeDtypeStruct((16, 128), jnp.float32),
            grid=(2,),
            in_specs=[pl.BlockSpec((8, 128), lambda i: (0, 0),
                                   pipeline_mode=pl.Buffered(buffer_count=1))],
            out_specs=pl.BlockSpec((8, 128), lambda i: (i, 0)),
        )(x)
        jax.block_until_ready(out)
        expect = x + 1.0
        _BUFFERED1_OK = bool(jnp.allclose(out[:8], expect)
                             and jnp.allclose(out[8:], expect))
    except Exception:
        _BUFFERED1_OK = False
    return _BUFFERED1_OK


# ---------------------------------------------------------------------------
# Tiling / VMEM planning
# ---------------------------------------------------------------------------
def _plan_tiles(batch, block_rows):
    """Row-block size (multiple of 8 sublanes) and padded batch size."""
    tm = max(_SUBLANES, _round_up(min(block_rows, batch), _SUBLANES))
    tc = _tc_count()
    if tc > 1:
        # Ensure the "parallel" batch axis has >= tc grid steps so both
        # v7x TensorCores get work (no-op for tiny batches).
        per_core = max(_SUBLANES, _round_up(-(-batch // tc), _SUBLANES))
        tm = min(tm, per_core)
    b_pad = _round_up(batch, tm)
    return tm, b_pad


def _vmem_limit_bytes(tm, obs_dim, out_pad, weights, single_buffer_weights):
    """Explicit VMEM ceiling (with headroom) only when we'd approach the default
    scoped limit (16 MiB v5e / 32 MiB v6e-v7x); otherwise leave the default."""
    w_factor = 1 if single_buffer_weights else 2
    w_bytes = sum(int(w.size) * w.dtype.itemsize for w in weights) * w_factor
    io_bytes = 2 * tm * (obs_dim + out_pad) * 4        # double-buffered x + out slab
    est = w_bytes + io_bytes
    if est <= (12 << 20):
        return None
    return int(min(2 * est + (8 << 20), 100 << 20))


# ---------------------------------------------------------------------------
# pallas_call builders (cached per static configuration)
# ---------------------------------------------------------------------------
@functools.lru_cache(maxsize=None)
def _make_slab_fn(obs_dim, out_pad, tm, b_pad, bf16_tanh, single_buf, vmem_limit):
    grid = (b_pad // tm,)

    def row_map(i):
        return (i, 0)

    def fixed_map(i):       # weights stay resident across the batch grid
        return (0, 0)

    def w_spec(shape):
        if single_buf:
            # Constant block index -> fetched once; no need for double buffering.
            return pl.BlockSpec(shape, fixed_map,
                                pipeline_mode=pl.Buffered(buffer_count=1))
        return pl.BlockSpec(shape, fixed_map)

    def slab_fn(x_pad, *weights):
        in_specs = [pl.BlockSpec((tm, obs_dim), row_map)] + [
            w_spec(w.shape) for w in weights
        ]
        return pl.pallas_call(
            functools.partial(_policy_kernel, bf16_tanh=bf16_tanh),
            out_shape=jax.ShapeDtypeStruct((b_pad, out_pad), jnp.float32),
            grid=grid,
            in_specs=in_specs,
            out_specs=pl.BlockSpec((tm, out_pad), row_map),
            compiler_params=pltpu.CompilerParams(
                dimension_semantics=("parallel",),   # shard batch across TCs (v7x)
                vmem_limit_bytes=vmem_limit,
            ),
        )(x_pad, *weights)

    return slab_fn


@functools.lru_cache(maxsize=None)
def _make_forward_fn(batch, obs_dim, action_dim, out_pad, tm, b_pad,
                     bf16_tanh, single_buf, vmem_limit):
    slab_fn = _make_slab_fn(obs_dim, out_pad, tm, b_pad,
                            bf16_tanh, single_buf, vmem_limit)

    def fwd(state, *weights):
        if b_pad != batch:
            state = jnp.pad(state, ((0, b_pad - batch), (0, 0)))
        slab = slab_fn(state, *weights)
        # Slices live in the SAME jit as the kernel so XLA fuses them with the
        # custom-call output instead of materializing extra HBM round trips.
        mean = slab[:batch, :action_dim]
        value = slab[:batch, action_dim:action_dim + 1]
        return mean, value

    return jax.jit(fwd)


# ---------------------------------------------------------------------------
# Public entry points
# ---------------------------------------------------------------------------
def policy_forward(state, packed, *, block_rows=1024):
    """Fused PPO PolicyNetwork forward (convenience API).

    state:  [B, obs_dim] float32
    packed: output of pack_params()
    returns (action_mean [B, action_dim], action_std [action_dim], value [B, 1])
    """
    batch, obs_dim = state.shape
    tm, b_pad = _plan_tiles(batch, block_rows)
    weights = _weight_tuple(packed)
    single_buf = _buffered1_supported()
    bf16_tanh = _bf16_tanh_ok()
    vmem_limit = _vmem_limit_bytes(tm, obs_dim, packed["out_pad"], weights, single_buf)

    fwd = _make_forward_fn(batch, obs_dim, packed["action_dim"], packed["out_pad"],
                           tm, b_pad, bf16_tanh, single_buf, vmem_limit)
    mean, value = fwd(state, *weights)
    return mean, packed["std"], value


def policy_forward_slab(state, packed, *, block_rows=1024):
    """Highest-throughput entry point: returns (slab, std) with NO re-slicing.

    slab is the raw padded [b_pad, out_pad] f32 kernel output:
      lanes [0:action_dim]         -> action_mean
      lane  [action_dim]           -> value
      lanes [action_dim+1:out_pad] -> zeros
      rows  [state.shape[0]:b_pad] -> padding rows
    Consume it directly (or slice inside your own jit with the consumer) to
    avoid re-reading the whole slab just to re-write ~(A+1)/128 of it.
    """
    batch, obs_dim = state.shape
    tm, b_pad = _plan_tiles(batch, block_rows)
    weights = _weight_tuple(packed)
    single_buf = _buffered1_supported()
    vmem_limit = _vmem_limit_bytes(tm, obs_dim, packed["out_pad"], weights, single_buf)
    slab_fn = _make_slab_fn(obs_dim, packed["out_pad"], tm, b_pad,
                            _bf16_tanh_ok(), single_buf, vmem_limit)
    if b_pad != batch:
        state = jnp.pad(state, ((0, b_pad - batch), (0, 0)))
    return slab_fn(state, *weights), packed["std"]


# ---------------------------------------------------------------------------
# Synthetic params + pure-JAX reference
# ---------------------------------------------------------------------------
def init_params(key, obs_dim, action_dim, hidden_dim):
    """Deterministic synthetic parameter init (weights [in, out], biases [1, out])."""
    ks = jax.random.split(key, 6)
    scale = 0.1

    def lin(k, fan_in, fan_out):
        return scale * jax.random.normal(k, (fan_in, fan_out), dtype=jnp.float32)

    return {
        "w1": lin(ks[0], obs_dim, hidden_dim),
        "b1": jnp.zeros((1, hidden_dim), jnp.float32),
        "w2": lin(ks[1], hidden_dim, hidden_dim),
        "b2": jnp.zeros((1, hidden_dim), jnp.float32),
        "wa1": lin(ks[2], hidden_dim, hidden_dim),
        "ba1": jnp.zeros((1, hidden_dim), jnp.float32),
        "wa2": lin(ks[3], hidden_dim, action_dim),
        "ba2": jnp.zeros((1, action_dim), jnp.float32),
        "wc1": lin(ks[4], hidden_dim, hidden_dim),
        "bc1": jnp.zeros((1, hidden_dim), jnp.float32),
        "wc2": lin(ks[5], hidden_dim, 1),
        "bc2": jnp.zeros((1, 1), jnp.float32),
        "log_std": jnp.zeros((1, action_dim), jnp.float32),  # nn.Parameter(torch.zeros(action_dim))
    }


def _reference_forward(state, p):
    h = jnp.tanh(state @ p["w1"] + p["b1"])
    h = jnp.tanh(h @ p["w2"] + p["b2"])
    a = jnp.tanh(h @ p["wa1"] + p["ba1"])
    mean = a @ p["wa2"] + p["ba2"]
    c = jnp.tanh(h @ p["wc1"] + p["bc1"])
    value = c @ p["wc2"] + p["bc2"]
    std = jnp.exp(p["log_std"]).reshape(-1)
    return mean, std, value


if __name__ == "__main__":
    obs_dim, action_dim, hidden_dim = 16, 4, 32
    batch = 8

    key = jax.random.PRNGKey(0)
    k_params, k_state = jax.random.split(key)

    params = init_params(k_params, obs_dim, action_dim, hidden_dim)
    packed = pack_params(params)   # one-time head fusion + bf16 cast + exp(log_std) hoist
    state = jax.random.normal(k_state, (batch, obs_dim), dtype=jnp.float32)

    action_mean, action_std, value = policy_forward(state, packed)
    jax.block_until_ready((action_mean, action_std, value))

    # correctness check against pure-JAX f32 reference (bf16 operands -> loose tol)
    ref_mean, ref_std, ref_value = _reference_forward(state, params)
    assert action_mean.shape == (batch, action_dim)
    assert action_std.shape == (action_dim,)
    assert value.shape == (batch, 1)
    assert jnp.allclose(action_mean, ref_mean, atol=2e-2, rtol=2e-2)
    assert jnp.allclose(action_std, ref_std, atol=1e-6)
    assert jnp.allclose(value, ref_value, atol=2e-2, rtol=2e-2)

    # also exercise the non-multiple-of-8 batch padding path
    state2 = jax.random.normal(jax.random.PRNGKey(1), (5, obs_dim), dtype=jnp.float32)
    m2, s2, v2 = policy_forward(state2, packed)
    jax.block_until_ready((m2, s2, v2))
    rm2, rs2, rv2 = _reference_forward(state2, params)
    assert jnp.allclose(m2, rm2, atol=2e-2, rtol=2e-2)
    assert jnp.allclose(v2, rv2, atol=2e-2, rtol=2e-2)

    # slab path (no wrapper-side re-slicing at all)
    slab, std_s, = policy_forward_slab(state2, packed)[0], packed["std"]
    jax.block_until_ready(slab)
    assert jnp.allclose(slab[:5, :action_dim], rm2, atol=2e-2, rtol=2e-2)
    assert jnp.allclose(slab[:5, action_dim:action_dim + 1], rv2, atol=2e-2, rtol=2e-2)

    print("KERNEL_OK")
</pallas_src>

<mosaic_0001>
module attributes {stable_mosaic.version = 11 : i64} {
  func.func @_probe_kernel(%arg0: i32, %arg1: memref<8x128xf32, #tpu.memory_space<vmem>>, %arg2: memref<8x128xf32, #tpu.memory_space<vmem>>) attributes {dimension_semantics = [#tpu.dimension_semantics<arbitrary>], iteration_bounds = array<i64: 2>, scalar_prefetch = 0 : i64, scratch_operands = 0 : i64, tpu.core_type = #tpu.core_type<tc>, window_params = [{pipeline_mode = #tpu.pipeline_mode<synchronous>, transform_indices = @transform_0, window_bounds = array<i64: 8, 128>}, {transform_indices = @transform_1, window_bounds = array<i64: 8, 128>}]} {
    %c0 = arith.constant 0 : index
    %c0_0 = arith.constant 0 : index
    %0 = vector.load %arg1[%c0, %c0_0] : memref<8x128xf32, #tpu.memory_space<vmem>>, vector<8x128xf32>
    %cst = arith.constant 1.000000e+00 : f32
    %1 = vector.broadcast %cst : f32 to vector<8x128xf32>
    %2 = arith.addf %0, %1 : vector<8x128xf32>
    %c0_1 = arith.constant 0 : index
    %c0_2 = arith.constant 0 : index
    %3 = vector.load %arg2[%c0_1, %c0_2] : memref<8x128xf32, #tpu.memory_space<vmem>>, vector<8x128xf32>
    tpu.vector_store %arg2[%c0_1, %c0_2], %2 {strides = array<i32>} : memref<8x128xf32, #tpu.memory_space<vmem>>, vector<8x128xf32>,
    return
  }
  func.func @transform_0(%arg0: i32) -> (i32, i32) {
    %c0_i32 = arith.constant 0 : i32
    %c0_i32_0 = arith.constant 0 : i32
    %c0_i32_1 = arith.constant 0 : i32
    return %c0_i32, %c0_i32_0 : i32, i32
  }
  func.func @transform_1(%arg0: i32) -> (i32, i32) {
    %c0_i32 = arith.constant 0 : i32
    %c0_i32_0 = arith.constant 0 : i32
    return %arg0, %c0_i32 : i32, i32
  }
}

module attributes {stable_mosaic.version = 11 : i64} {
  func.func @_policy_kernel(%arg0: i32, %arg1: memref<8x16xf32, #tpu.memory_space<vmem>>, %arg2: memref<16x32xbf16, #tpu.memory_space<vmem>>, %arg3: memref<1x32xf32, #tpu.memory_space<vmem>>, %arg4: memref<32x32xbf16, #tpu.memory_space<vmem>>, %arg5: memref<1x32xf32, #tpu.memory_space<vmem>>, %arg6: memref<32x64xbf16, #tpu.memory_space<vmem>>, %arg7: memref<1x64xf32, #tpu.memory_space<vmem>>, %arg8: memref<64x128xbf16, #tpu.memory_space<vmem>>, %arg9: memref<1x128xf32, #tpu.memory_space<vmem>>, %arg10: memref<8x128xf32, #tpu.memory_space<vmem>>) attributes {dimension_semantics = [#tpu.dimension_semantics<parallel>], iteration_bounds = array<i64: 1>, scalar_prefetch = 0 : i64, scratch_operands = 0 : i64, tpu.core_type = #tpu.core_type<tc>, window_params = [{transform_indices = @transform_0, window_bounds = array<i64: 8, 16>}, {pipeline_mode = #tpu.pipeline_mode<synchronous>, transform_indices = @transform_1, window_bounds = array<i64: 16, 32>}, {pipeline_mode = #tpu.pipeline_mode<synchronous>, transform_indices = @transform_2, window_bounds = array<i64: 1, 32>}, {pipeline_mode = #tpu.pipeline_mode<synchronous>, transform_indices = @transform_3, window_bounds = array<i64: 32, 32>}, {pipeline_mode = #tpu.pipeline_mode<synchronous>, transform_indices = @transform_4, window_bounds = array<i64: 1, 32>}, {pipeline_mode = #tpu.pipeline_mode<synchronous>, transform_indices = @transform_5, window_bounds = array<i64: 32, 64>}, {pipeline_mode = #tpu.pipeline_mode<synchronous>, transform_indices = @transform_6, window_bounds = array<i64: 1, 64>}, {pipeline_mode = #tpu.pipeline_mode<synchronous>, transform_indices = @transform_7, window_bounds = array<i64: 64, 128>}, {pipeline_mode = #tpu.pipeline_mode<synchronous>, transform_indices = @transform_8, window_bounds = array<i64: 1, 128>}, {transform_indices = @transform_9, window_bounds = array<i64: 8, 128>}]} {
    %c0 = arith.constant 0 : index
    %c0_0 = arith.constant 0 : index
    %0 = vector.load %arg1[%c0, %c0_0] : memref<8x16xf32, #tpu.memory_space<vmem>>, vector<8x16xf32>
    %1 = arith.truncf %0 : vector<8x16xf32> to vector<8x16xbf16>
    %c0_1 = arith.constant 0 : index
    %c0_2 = arith.constant 0 : index
    %2 = vector.load %arg2[%c0_1, %c0_2] : memref<16x32xbf16, #tpu.memory_space<vmem>>, vector<16x32xbf16>
    %cst = arith.constant dense<0.000000e+00> : vector<8x32xf32>
    %3 = tpu.matmul %1, %2, %cst {dimension_numbers = #tpu.dot_dimension_numbers<[1], [0], [0], [1], [0, 0, 1, 1], [], []>} : vector<8x16xbf16>, vector<16x32xbf16>, vector<8x32xf32> -> vector<8x32xf32>
    %c0_3 = arith.constant 0 : index
    %c0_4 = arith.constant 0 : index
    %4 = vector.load %arg3[%c0_3, %c0_4] : memref<1x32xf32, #tpu.memory_space<vmem>>, vector<1x32xf32>
    %5 = vector.broadcast %4 : vector<1x32xf32> to vector<8x32xf32>
    %6 = arith.addf %3, %5 : vector<8x32xf32>
    %7 = math.tanh %6 : vector<8x32xf32>
    %8 = arith.truncf %7 : vector<8x32xf32> to vector<8x32xbf16>
    %c0_5 = arith.constant 0 : index
    %c0_6 = arith.constant 0 : index
    %9 = vector.load %arg4[%c0_5, %c0_6] : memref<32x32xbf16, #tpu.memory_space<vmem>>, vector<32x32xbf16>
    %cst_7 = arith.constant dense<0.000000e+00> : vector<8x32xf32>
    %10 = tpu.matmul %8, %9, %cst_7 {dimension_numbers = #tpu.dot_dimension_numbers<[1], [0], [0], [1], [0, 0, 1, 1], [], []>} : vector<8x32xbf16>, vector<32x32xbf16>, vector<8x32xf32> -> vector<8x32xf32>
    %c0_8 = arith.constant 0 : index
    %c0_9 = arith.constant 0 : index
    %11 = vector.load %arg5[%c0_8, %c0_9] : memref<1x32xf32, #tpu.memory_space<vmem>>, vector<1x32xf32>
    %12 = vector.broadcast %11 : vector<1x32xf32> to vector<8x32xf32>
    %13 = arith.addf %10, %12 : vector<8x32xf32>
    %14 = math.tanh %13 : vector<8x32xf32>
    %15 = arith.truncf %14 : vector<8x32xf32> to vector<8x32xbf16>
    %c0_10 = arith.constant 0 : index
    %c0_11 = arith.constant 0 : index
    %16 = vector.load %arg6[%c0_10, %c0_11] : memref<32x64xbf16, #tpu.memory_space<vmem>>, vector<32x64xbf16>
    %cst_12 = arith.constant dense<0.000000e+00> : vector<8x64xf32>
    %17 = tpu.matmul %15, %16, %cst_12 {dimension_numbers = #tpu.dot_dimension_numbers<[1], [0], [0], [1], [0, 0, 1, 1], [], []>} : vector<8x32xbf16>, vector<32x64xbf16>, vector<8x64xf32> -> vector<8x64xf32>
    %c0_13 = arith.constant 0 : index
    %c0_14 = arith.constant 0 : index
    %18 = vector.load %arg7[%c0_13, %c0_14] : memref<1x64xf32, #tpu.memory_space<vmem>>, vector<1x64xf32>
    %19 = vector.broadcast %18 : vector<1x64xf32> to vector<8x64xf32>
    %20 = arith.addf %17, %19 : vector<8x64xf32>
    %21 = math.tanh %20 : vector<8x64xf32>
    %22 = arith.truncf %21 : vector<8x64xf32> to vector<8x64xbf16>
    %c0_15 = arith.constant 0 : index
    %c0_16 = arith.constant 0 : index
    %23 = vector.load %arg8[%c0_15, %c0_16] : memref<64x128xbf16, #tpu.memory_space<vmem>>, vector<64x128xbf16>
    %cst_17 = arith.constant dense<0.000000e+00> : vector<8x128xf32>
    %24 = tpu.matmul %22, %23, %cst_17 {dimension_numbers = #tpu.dot_dimension_numbers<[1], [0], [0], [1], [0, 0, 1, 1], [], []>} : vector<8x64xbf16>, vector<64x128xbf16>, vector<8x128xf32> -> vector<8x128xf32>
    %c0_18 = arith.constant 0 : index
    %c0_19 = arith.constant 0 : index
    %25 = vector.load %arg9[%c0_18, %c0_19] : memref<1x128xf32, #tpu.memory_space<vmem>>, vector<1x128xf32>
    %26 = vector.broadcast %25 : vector<1x128xf32> to vector<8x128xf32>
    %27 = arith.addf %24, %26 : vector<8x128xf32>
    %c0_20 = arith.constant 0 : index
    %c0_21 = arith.constant 0 : index
    %28 = vector.load %arg10[%c0_20, %c0_21] : memref<8x128xf32, #tpu.memory_space<vmem>>, vector<8x128xf32>
    tpu.vector_store %arg10[%c0_20, %c0_21], %27 {strides = array<i32>} : memref<8x128xf32, #tpu.memory_space<vmem>>, vector<8x128xf32>,
    return
  }
  func.func @transform_0(%arg0: i32) -> (i32, i32) {
    %c0_i32 = arith.constant 0 : i32
    %c0_i32_0 = arith.constant 0 : i32
    return %arg0, %c0_i32 : i32, i32
  }
  func.func @transform_1(%arg0: i32) -> (i32, i32) {
    %c0_i32 = arith.constant 0 : i32
    %c0_i32_0 = arith.constant 0 : i32
    %c0_i32_1 = arith.constant 0 : i32
    return %c0_i32, %c0_i32_0 : i32, i32
  }
  func.func @transform_2(%arg0: i32) -> (i32, i32) {
    %c0_i32 = arith.constant 0 : i32
    %c0_i32_0 = arith.constant 0 : i32
    %c0_i32_1 = arith.constant 0 : i32
    return %c0_i32, %c0_i32_0 : i32, i32
  }
  func.func @transform_3(%arg0: i32) -> (i32, i32) {
    %c0_i32 = arith.constant 0 : i32
    %c0_i32_0 = arith.constant 0 : i32
    %c0_i32_1 = arith.constant 0 : i32
    return %c0_i32, %c0_i32_0 : i32, i32
  }
  func.func @transform_4(%arg0: i32) -> (i32, i32) {
    %c0_i32 = arith.constant 0 : i32
    %c0_i32_0 = arith.constant 0 : i32
    %c0_i32_1 = arith.constant 0 : i32
    return %c0_i32, %c0_i32_0 : i32, i32
  }
  func.func @transform_5(%arg0: i32) -> (i32, i32) {
    %c0_i32 = arith.constant 0 : i32
    %c0_i32_0 = arith.constant 0 : i32
    %c0_i32_1 = arith.constant 0 : i32
    return %c0_i32, %c0_i32_0 : i32, i32
  }
  func.func @transform_6(%arg0: i32) -> (i32, i32) {
    %c0_i32 = arith.constant 0 : i32
    %c0_i32_0 = arith.constant 0 : i32
    %c0_i32_1 = arith.constant 0 : i32
    return %c0_i32, %c0_i32_0 : i32, i32
  }
  func.func @transform_7(%arg0: i32) -> (i32, i32) {
    %c0_i32 = arith.constant 0 : i32
    %c0_i32_0 = arith.constant 0 : i32
    %c0_i32_1 = arith.constant 0 : i32
    return %c0_i32, %c0_i32_0 : i32, i32
  }
  func.func @transform_8(%arg0: i32) -> (i32, i32) {
    %c0_i32 = arith.constant 0 : i32
    %c0_i32_0 = arith.constant 0 : i32
    %c0_i32_1 = arith.constant 0 : i32
    return %c0_i32, %c0_i32_0 : i32, i32
  }
  func.func @transform_9(%arg0: i32) -> (i32, i32) {
    %c0_i32 = arith.constant 0 : i32
    %c0_i32_0 = arith.constant 0 : i32
    return %arg0, %c0_i32 : i32, i32
  }
}

</mosaic_0001>

<bundles_post_ra>
// kernel: tpu_custom_call.1
= control target key start
LH: loop header
LB: loop body
LE: loop exit
PB: predicated region body
PF: predicated region fallthrough
CT: control target
= control target key end

     0   :  { %6 = vsyncpa [#allocation3], 0  ;;  %s482_s0 = inlined_call_operand.hbm [shape: f32[8,128], index: 0, kind: input, shape index: {}]   ;;  %s483_s1 = inlined_call_operand.hbm [shape: f32[16,128], index: 1, kind: output, shape index: {}]  }
   0x1   :  { %7 = vsyncpa [#allocation4], 0 }
   0x2   :  { %9 = vsyncpa [#allocation4 + $0x1], 0  ;;  %s352_s6 = smov 0   ;;  %s354_s7 = smov 0  }
   0x3   :  { %s356_s8 = smov 0   ;;  %s358_s9 = smov 0  }
   0x4 LB: > { %s373_s10 = sadd.s32 4294967295, %s338_s9   ;;  %s184_s11 = sadd.s32 4294967294, %s338_s9   ;;  %s338_s9 = sphi %s358_s9, %s499_s9   ;;  %s334_s8 = sphi %s356_s8, %s498_s8   ;;  %s330_s7 = sphi %s354_s7, %s497_s7   ;;  %s326_s6 = sphi %s352_s6, %s496_s6  }
   0x5   : > { %s377_s12 = sadd.s32 1, %s338_s9   ;;  %s43_s13 = sadd.s32 1, %s334_s8 }
   0x6   : > { %s40_s14 = ssub.s32 %s338_s9, %s377_s12  ;;  %p53_p0 = scmp.ne.s32.totalorder %s334_s8, %s330_s7 }
   0x7   : > { %p41_p1 = scmp.eq.s32.totalorder %s40_s14, 0  ;;  %p54_p2 = scmp.eq.s32.totalorder %s373_s10, 1 }
   0x8   : > { %p59_p3 = scmp.ne.s32.totalorder %s330_s7, %s326_s6  ;;  %p60_p4 = scmp.eq.s32.totalorder %s184_s11, 1 }
   0x9   : > { %s388_s15 = scalar_select %p41_p1, %s334_s8, %s43_s13  }
   0xa   : > { %p390_p5 = por %p54_p2, %p53_p0  ;;  %p394_p6 = por %p60_p4, %p59_p3 }
   0xb   : > { %p185_p7 = scmp.ge.s32.totalorder %s338_s9, 1  ;;  %p67_p8 = scmp.lt.s32.totalorder %s338_s9, 3 }
   0xc   : > { %s487_s16 = scalar_select %p390_p5, 1, 0 }
   0xd   : > { %s488_s17 = scalar_select %p394_p6, 1, 0 }
   0xe   : > { %p484_p9 = scmp.eq.s32.totalorder %s373_s10, 0  ;;  %p401_p10 = pnand %p185_p7, %p67_p8 }
   0xf   : > { %s340_s19 = smov [#allocation2]   ;;  %s244_s24 = scalar_lea.hbm %s482_s0, 128 }
  0x10   : > { %s489_s18 = scalar_select %p401_p10, 1, 0 }
  0x11   : > { %s80_s20 = sshll.u32 %s340_s19, 4  ;;  %p200_p11 = pneg %p401_p10  ;;  %s81_s20 = int_to_ptr.vmem [resolvable:$true] %s80_s20 }
  0x12   : > { %p245_p13 = scmp.ne.s32.totalorder %s482_s0, %s244_s24  ;;  %p251_p3 = scmp.lt.u32.totalorder %s244_s24, %s482_s0 }
  0x13   : > { %p409_p12 = pnand %p484_p9, %p200_p11 }
  0x15   : > { %p246_p0 = pneg %p409_p12 }
  0x17   : > { %p247_p1 = pnand %p246_p0, %p245_p13 }
  0x19   : > { %p248_p2 = pneg %p247_p1 }
  0x1b   : > { %p253_p4 = pnand %p251_p3, %p248_p2 }
  0x1d   : > { %256 = shalt.err (!%p253_p4)
}
  0x1e   : > { %s257_s29 = scalar_lea.vmem %s81_s20, 128  ;;  %p265_p9 = scmp.lt.s32.totalorder %s81_s20, %s81_s20 }
  0x1f   : > { %p258_p7 = scmp.ne.s32.totalorder %s81_s20, %s257_s29  ;;  %p266_p6 = scmp.lt.s32.totalorder %s257_s29, %s257_s29 }
  0x21   : > { %p260_p8 = pnand %p258_p7, %p246_p0  ;;  %p267_p5 = por %p266_p6, %p265_p9 }
  0x23   : > { %p261_p11 = pneg %p260_p8 }
  0x25   : > { %p268_p10 = pnand %p267_p5, %p261_p11 }
  0x27   : > { %271 = shalt.err (!%p268_p10)
}
  0x28   : > { %203 = dma.hbm_to_vmem [thread:$0]  (!%p409_p12), %s482_s0, 128, %s81_s20, [#allocation3]  }
  0x29   : > { %p491_p13 = scmp.ne.s32.totalorder %s489_s18, 0 }
  0x2a   : > { %p492_p1 = scmp.eq.s32.totalorder (!%p491_p13), %s373_s10, 0 }
  0x2b   : > { %93 = sbr.rel (%p491_p13) target bundleno = 77 (0x4d), region = 24 }
  0x32   : > { %317 = dma.done.wait (%p492_p1), [#allocation3], 128   ;;  %p493_p0 = pmov %p492_p1 }
  0x33   : > { %s105_s3 = sand.u32 1, %s330_s7   ;;  %s191_s13 = sshll.u32 %s373_s10, 7  ;;  %v108_v0 = vld [vmem:[#allocation2] sm:$0xff] }
  0x34   : > { %319 = vsyncadd (%p493_p0), [#allocation3], 4294967168  ;;  %s189_s4 = sshll.u32 %s105_s3, 3  ;;  %v109_v1 = vadd.f32 1.0, %v108_v0  ;;  %s442_s19 = scalar_lea.hbm %s483_s1, %s191_s13 }
  0x35   : > { %s107_s5 = scalar_lea.vmem [#allocation5], %s189_s4  ;;  %s112_s20 = scalar_lea.sflag [#allocation4], %s105_s3 }
  0x36   : > { %s125_s11 = sshll.u32 %s107_s5, 4  ;;  %110 = vst [vmem:[%s107_s5] sm:$0xff] %v109_v1  ;;  %p494_p6 = scmp.ne.s32.totalorder %s487_s16, 0  ;;  %s437_s11 = int_to_ptr.vmem [resolvable:$true] %s125_s11 }
  0x37   : > { %s272_s21 = scalar_lea.vmem %s437_s11, 128  ;;  %s341_s10 = smov [#allocation5]  }
  0x38   : > { %p273_p5 = scmp.ne.s32.totalorder %s437_s11, %s272_s21  ;;  %s276_s22 = sshll.u32 %s341_s10, 4  ;;  %s277_s22 = int_to_ptr.vmem [resolvable:$false] %s276_s22 }
  0x39   : > { %s278_s23 = scalar_lea.vmem %s277_s22, 256  ;;  %p279_p12 = scmp.lt.s32.totalorder %s437_s11, %s277_s22 }
  0x3a   : > { %p274_p9 = pnand %p273_p5, %p494_p6  ;;  %p280_p2 = scmp.lt.s32.totalorder %s278_s23, %s272_s21 }
  0x3c   : > { %p275_p10 = pneg %p274_p9  ;;  %p281_p3 = por %p280_p2, %p279_p12 }
  0x3e   : > { %p282_p4 = pnand %p281_p3, %p275_p10 }
  0x40   : > { %285 = shalt.err (!%p282_p4)
}
  0x41   : > { %s286_s24 = scalar_lea.hbm %s442_s19, 128  ;;  %s290_s27 = scalar_lea.hbm %s483_s1, 256 }
  0x42   : > { %p287_p7 = scmp.ne.s32.totalorder %s442_s19, %s286_s24  ;;  %p291_p13 = scmp.lt.u32.totalorder %s442_s19, %s483_s1 }
  0x43   : > { %p292_p1 = scmp.lt.u32.totalorder %s290_s27, %s286_s24  ;;  %p294_p5 = scmp.lt.u32.totalorder %s286_s24, %s442_s19 }
  0x44   : > { %p288_p8 = pnand %p287_p7, %p494_p6 }
  0x45   : > { %p293_p0 = por %p292_p1, %p291_p13 }
  0x46   : > { %p289_p11 = pneg %p288_p8 }
  0x47   : > { %p295_p9 = por %p294_p5, %p293_p0 }
  0x49   : > { %p296_p10 = pnand %p295_p9, %p289_p11 }
  0x4b   : > { %299 = shalt.err (!%p296_p10)
}
  0x4c   : > { %198 = dma.vmem_to_hbm [thread:$0]  (%p494_p6), %s437_s11, 128, %s442_s19, %s112_s20  }
  0x4d PF: > { %p210_p12 = scmp.ge.s32.totalorder %s338_s9, 2  ;;  %s137_s30 = sand.u32 1, %s326_s6  }
  0x4e   : > { %p495_p2 = scmp.ne.s32.totalorder %s488_s17, 0  ;;  %s138_s2 = scalar_lea.sflag [#allocation4], %s137_s30 }
  0x50   : > { %p205_p3 = pnand %p210_p12, %p495_p2 }
  0x52   : > { %321 = dma.done.wait (!%p205_p3), %s138_s2, 128  }
  0x53   : > { %323 = vsyncadd (!%p205_p3), %s138_s2, 4294967168  ;;  %p12_p4 = scmp.ge.s32.totalorder %s377_s12, 4   ;;  %s496_s6 = smov %s330_s7 }
  0x54   : > { %s497_s7 = smov %s334_s8  ;;  %s498_s8 = smov %s388_s15 }
  0x55   : > { %s499_s9 = smov %s377_s12  ;;  %14 = sbr.rel (!%p12_p4) target bundleno = 4 (0x4), region = 61 }
  0x5c   :  { %143 = vsyncpa [#allocation3], 1 }
  0x5d   :  { %145 = vsyncpa [#allocation3 + $0x1], 1 }
  0x5e   :  { %146 = vsyncpa [#allocation4], 1 }
  0x5f   :  { %148 = vsyncpa [#allocation4 + $0x1], 1 }

// kernel: fwd.1
= control target key start
LH: loop header
LB: loop body
LE: loop exit
PB: predicated region body
PF: predicated region fallthrough
CT: control target
= control target key end

     0   :  { %14 = vsyncpa [#allocation3], 0  ;;  %s751_s0 = inlined_call_operand.vmem [shape: f32[8,16], index: 0, kind: input, shape index: {}]   ;;  %s752_s1 = inlined_call_operand.hbm [shape: bf16[16,32], index: 1, kind: input, shape index: {}]   ;;  %s753_s2 = inlined_call_operand.vmem [shape: f32[1,32], index: 2, kind: input, shape index: {}]   ;;  %s754_s3 = inlined_call_operand.vmem [shape: bf16[32,32], index: 3, kind: input, shape index: {}]   ;;  %s755_s4 = inlined_call_operand.vmem [shape: f32[1,32], index: 4, kind: input, shape index: {}]   ;;  %s756_s5 = inlined_call_operand.hbm [shape: bf16[32,64], index: 5, kind: input, shape index: {}]   ;;  %s757_s6 = inlined_call_operand.hbm [shape: f32[1,64], index: 6, kind: input, shape index: {}]   ;;  %s758_s7 = inlined_call_operand.hbm [shape: bf16[64,128], index: 7, kind: input, shape index: {}]   ;;  %s759_s8 = inlined_call_operand.hbm [shape: f32[1,128], index: 8, kind: input, shape index: {}]   ;;  %s760_s9 = inlined_call_operand.vmem [shape: f32[8,128], index: 9, kind: output, shape index: {}]  }
   0x1   :  { %15 = vsyncpa [#allocation5], 0 }
   0x2   :  { %16 = vsyncpa [#allocation8], 0  ;;  %s592_s30 = smov [#allocation4]   ;;  %s593_s11 = smov [#allocation7]  }
   0x3   :  { %s42_s10 = sshll.u32 %s592_s30, 4  ;;  %s64_s12 = sshll.u32 %s593_s11, 4  ;;  %s43_s10 = int_to_ptr.vmem [resolvable:$true] %s42_s10  ;;  %s651_s12 = int_to_ptr.vmem [resolvable:$true] %s64_s12 }
   0x4   :  { %s476_s15 = scalar_lea.hbm %s756_s5, 256 }
   0x5   :  { %p477_p0 = scmp.ne.s32.totalorder %s756_s5, %s476_s15  ;;  %p480_p1 = scmp.lt.u32.totalorder %s476_s15, %s756_s5 }
   0x7   :  { %p482_p2 = pnand %p480_p1, %p477_p0 }
   0x9   :  { %485 = shalt.err (!%p482_p2)
}
   0xa   :  { %s486_s20 = scalar_lea.vmem %s43_s10, 256  ;;  %p491_p4 = scmp.lt.s32.totalorder %s43_s10, %s43_s10 }
   0xb   :  { %p487_p3 = scmp.ne.s32.totalorder %s43_s10, %s486_s20  ;;  %p492_p5 = scmp.lt.s32.totalorder %s486_s20, %s486_s20 }
   0xd   :  { %p493_p6 = por %p492_p5, %p491_p4 }
   0xf   :  { %p494_p7 = pnand %p493_p6, %p487_p3 }
  0x11   :  { %497 = shalt.err (!%p494_p7)
}
  0x12   :  { %s594_s21 = smov 64   ;;  %s595_s22 = smov 4  }
  0x13   :  { %48 = dma.hbm_to_vmem [thread:$0]  %s756_s5, 256, %s43_s10, [#allocation5], %s594_s21, %s594_s21, %s595_s22  }
  0x14   :  { %s498_s27 = scalar_lea.hbm %s758_s7, 512 }
  0x15   :  { %p499_p8 = scmp.ne.s32.totalorder %s758_s7, %s498_s27  ;;  %p502_p9 = scmp.lt.u32.totalorder %s498_s27, %s758_s7 }
  0x17   :  { %p504_p10 = pnand %p502_p9, %p499_p8 }
  0x19   :  { %507 = shalt.err (!%p504_p10)
}
  0x1a   :  { %s508_s13 = scalar_lea.vmem %s651_s12, 512  ;;  %p513_p12 = scmp.lt.s32.totalorder %s651_s12, %s651_s12 }
  0x1b   :  { %p509_p11 = scmp.ne.s32.totalorder %s651_s12, %s508_s13  ;;  %p514_p13 = scmp.lt.s32.totalorder %s508_s13, %s508_s13 }
  0x1d   :  { %p515_p0 = por %p514_p13, %p513_p12 }
  0x1f   :  { %p516_p1 = pnand %p515_p0, %p509_p11 }
  0x21   :  { %519 = shalt.err (!%p516_p1)
}
  0x22   :  { %70 = dma.hbm_to_vmem [thread:$0]  %s758_s7, 512, %s651_s12, [#allocation8], %s594_s21, %s594_s21, %s595_s22  }
  0x23   :  { %s596_s14 = smov [#allocation2]   ;;  %s597_s16 = smov [#allocation6]  }
  0x24   :  { %s24_s15 = sshll.u32 %s596_s14, 4  ;;  %s55_s17 = sshll.u32 %s597_s16, 4  ;;  %s25_s15 = int_to_ptr.vmem [resolvable:$true] %s24_s15  ;;  %s56_s17 = int_to_ptr.vmem [resolvable:$true] %s55_s17 }
  0x25   :  { %s520_s20 = scalar_lea.hbm %s752_s1, 128 }
  0x26   :  { %p521_p2 = scmp.ne.s32.totalorder %s752_s1, %s520_s20  ;;  %p524_p3 = scmp.lt.u32.totalorder %s520_s20, %s752_s1 }
  0x28   :  { %p526_p4 = pnand %p524_p3, %p521_p2 }
  0x2a   :  { %529 = shalt.err (!%p526_p4)
}
  0x2b   :  { %s530_s7 = scalar_lea.vmem %s25_s15, 128  ;;  %p535_p6 = scmp.lt.s32.totalorder %s25_s15, %s25_s15 }
  0x2c   :  { %p531_p5 = scmp.ne.s32.totalorder %s25_s15, %s530_s7  ;;  %p536_p7 = scmp.lt.s32.totalorder %s530_s7, %s530_s7 }
  0x2e   :  { %p537_p8 = por %p536_p7, %p535_p6 }
  0x30   :  { %p538_p9 = pnand %p537_p8, %p531_p5 }
  0x32   :  { %541 = shalt.err (!%p538_p9)
}
  0x33   :  { %30 = dma.hbm_to_vmem [thread:$0]  %s752_s1, 128, %s25_s15, [#allocation3], %s594_s21, %s594_s21, %s595_s22  }
  0x34   :  { %s542_s30 = scalar_lea.hbm %s757_s6, 16 }
  0x35   :  { %p543_p10 = scmp.ne.s32.totalorder %s757_s6, %s542_s30  ;;  %p546_p11 = scmp.lt.u32.totalorder %s542_s30, %s757_s6 }
  0x37   :  { %p548_p12 = pnand %p546_p11, %p543_p10 }
  0x39   :  { %551 = shalt.err (!%p548_p12)
}
  0x3a   :  { %s552_s14 = scalar_lea.vmem %s56_s17, 16  ;;  %s556_s16 = scalar_lea.vmem %s56_s17, 32 }
  0x3b   :  { %p553_p13 = scmp.ne.s32.totalorder %s56_s17, %s552_s14  ;;  %p557_p0 = scmp.lt.s32.totalorder %s56_s17, %s56_s17 }
  0x3c   :  { %p558_p1 = scmp.lt.s32.totalorder %s556_s16, %s552_s14 }
  0x3e   :  { %p559_p2 = por %p558_p1, %p557_p0 }
  0x40   :  { %p560_p3 = pnand %p559_p2, %p553_p13 }
  0x42   :  { %563 = shalt.err (!%p560_p3)
}
  0x43   :  { %58 = dma.hbm_to_vmem [thread:$0]  %s757_s6, 16, %s56_s17, [#allocation5]  }
  0x44   :  { %s598_s22 = smov [#allocation9]   ;;  %s564_s20 = scalar_lea.hbm %s759_s8, 16 }
  0x45   :  { %s77_s15 = sshll.u32 %s598_s22, 4  ;;  %p565_p4 = scmp.ne.s32.totalorder %s759_s8, %s564_s20  ;;  %s78_s15 = int_to_ptr.vmem [resolvable:$true] %s77_s15 }
  0x46   :  { %p568_p5 = scmp.lt.u32.totalorder %s564_s20, %s759_s8 }
  0x48   :  { %p570_p6 = pnand %p568_p5, %p565_p4 }
  0x4a   :  { %573 = shalt.err (!%p570_p6)
}
  0x4b   :  { %s574_s7 = scalar_lea.vmem %s78_s15, 16  ;;  %s578_s6 = scalar_lea.vmem %s78_s15, 32 }
  0x4c   :  { %p575_p7 = scmp.ne.s32.totalorder %s78_s15, %s574_s7  ;;  %p579_p8 = scmp.lt.s32.totalorder %s78_s15, %s78_s15 }
  0x4d   :  { %p580_p9 = scmp.lt.s32.totalorder %s578_s6, %s574_s7 }
  0x4f   :  { %p581_p10 = por %p580_p9, %p579_p8 }
  0x51   :  { %p582_p11 = pnand %p581_p10, %p575_p7 }
  0x53   :  { %585 = shalt.err (!%p582_p11)
}
  0x54   :  { %80 = dma.hbm_to_vmem [thread:$0]  %s759_s8, 16, %s78_s15, [#allocation8]  }
  0x55   :  { %586 = dma.done.wait [#allocation3], 128  }
  0x56   :  { %587 = vsyncadd [#allocation3], 4294967168 }
  0x57   :  { %588 = dma.done.wait [#allocation5], 272  }
  0x58   :  { %589 = vsyncadd [#allocation5], 4294967024 }
  0x59   :  { %590 = dma.done.wait [#allocation8], 528  }
  0x5a   :  { %591 = vsyncadd [#allocation8], 4294966768  ;;  %v599_v0 = vmov 0.0   ;;  %vm600_vm0 = vmmov 0   ;;  %v461_v1 = vld [vmem:[#allocation2] sm:$0xff]   ;;  %vm114_vm1 = vcmask 130048  }
  0x5b   :  { %418 = vmatprep.subr.bf16.mxu0 %v599_v0  ;;  %420 = vmatprep.mubr.msk.bf16.mxu0 %vm600_vm0, %v599_v0  ;;  %v97_v2 = vld [vmem:[%s751_s0] sm:$0xff]  ;;  %v463_v5 = vld [vmem:[%s754_s3 + $0x8] sm:$0xff]   ;;  %vm183_vm2 = vcmask 261120   ;;  %v465_v15 = vld [vmem:[#allocation4 + $0x8] sm:$0xff]   ;;  %vm336_vm3 = vcmask 523264  }
  0x5c   :  { %440 = vmatprep.subr.bf16.mxu1 %v599_v0  ;;  %448 = vmatprep.mubr.msk.bf16.mxu1 %vm600_vm0, %v599_v0  ;;  %v98_v3 = vpack.c.bf16 %v97_v2, %v97_v2  ;;  %v462_v4 = vld [vmem:[%s754_s3] sm:$0xff]   ;;  %v464_v14 = vld [vmem:[#allocation4] sm:$0xff]   ;;  %v469_v27 = vld [vmem:[#allocation7 + $0x18] sm:$0xff]  }
  0x5d   :  { %419 = vmatpush3.bf16.msra.mxu0 %v461_v1  ;;  %v388_v6 = vld [vmem:[%s753_s2] ss:$0 sm:$0xff]  ;;  %v467_v25 = vld [vmem:[#allocation7 + $0x8] sm:$0xff]   ;;  %v468_v26 = vld [vmem:[#allocation7 + $0x10] sm:$0xff]  }
  0x5e   :  { %424 = vmatprep.subr.bf16.mxu0 %v599_v0  ;;  %v391_v16 = vld [vmem:[%s755_s4] ss:$0 sm:$0xff]  ;;  %v395_v28 = vld [vmem:[#allocation6] ss:$0 sm:$0xff]  ;;  %v399_v36 = vld [vmem:[#allocation9] ss:$0 sm:$0xff] }
  0x5f   :  { %v466_v24 = vld [vmem:[#allocation7] sm:$0xff]  }
  0x60   :  { %421 = vmatmul.mubr.msk.bf16.vlgmr.msra.gmra.mrb[0].mxu0 %vm114_vm1, %v98_v3  ;;  %441 = vmatpush3.bf16.msra.mxu1 %v466_v24 }
  0x61   :  { %428 = vmatprep.mubr.msk.bf16.mxu0 %vm600_vm0, %v599_v0  ;;  %425 = vmatpush3.bf16.msra.mxu0 %v462_v4 }
  0x62   :  { %426 = vmatprep.subr.bf16.mxu0 %v599_v0  ;;  %442 = vmatprep.subr.bf16.mxu1 %v599_v0 }
  0x64   :  { %443 = vmatpush3.bf16.msra.mxu1 %v467_v25 }
  0x65   :  { %427 = vmatpush3.bf16.msra.mxu0 %v463_v5  ;;  %444 = vmatprep.subr.bf16.mxu1 %v599_v0 }
  0x66   :  { %432 = vmatprep.subr.bf16.mxu0 %v599_v0 }
  0x68   :  { %445 = vmatpush3.bf16.msra.mxu1 %v468_v26 }
  0x69   :  { %446 = vmatprep.subr.bf16.mxu1 %v599_v0 }
  0x6c   :  { %447 = vmatpush3.bf16.msra.mxu1 %v469_v27 }
 0x133   :  { %v152_v7 = vpop.f32.mrb[0].mxu0 }
 0x134   :  { %v153_v8 = vadd.f32 %v388_v6, %v152_v7  ;;  %v422_v9 = vpop.f32.mrb[1].mxu0 }
 0x135   :  { %v155_v10 = vpop.f32.mrb[2].mxu0 }
 0x136   :  { %470 = vtanh.f32 %v153_v8  ;;  %v423_v11 = vpop.f32.mrb[3].mxu0 }
 0x140   :  { %v471_v12 = vpop.eup %470 }
 0x141   :  { %v159_v13 = vpack.c.bf16 %v471_v12, %v471_v12 }
 0x143   :  { %429 = vmatmul.mubr.msk.bf16.vlgmr.msra.gmra.mrb[4].mxu0 %vm183_vm2, %v159_v13 }
 0x144   :  { %436 = vmatprep.mubr.msk.bf16.mxu0 %vm600_vm0, %v599_v0  ;;  %433 = vmatpush3.bf16.msra.mxu0 %v464_v14 }
 0x145   :  { %434 = vmatprep.subr.bf16.mxu0 %v599_v0 }
 0x148   :  { %435 = vmatpush3.bf16.msra.mxu0 %v465_v15 }
 0x216   :  { %v221_v17 = vpop.f32.mrb[4].mxu0 }
 0x217   :  { %v222_v18 = vadd.f32 %v391_v16, %v221_v17  ;;  %v430_v19 = vpop.f32.mrb[5].mxu0 }
 0x218   :  { %v224_v20 = vpop.f32.mrb[6].mxu0 }
 0x219   :  { %472 = vtanh.f32 %v222_v18  ;;  %v431_v21 = vpop.f32.mrb[7].mxu0 }
 0x223   :  { %v473_v22 = vpop.eup %472 }
 0x224   :  { %v228_v23 = vpack.c.bf16 %v473_v22, %v473_v22 }
 0x226   :  { %437 = vmatmul.mubr.msk.bf16.vlgmr.msra.gmra.mrb[8].mxu0 %vm183_vm2, %v228_v23 }
 0x2f9   :  { %v289_v29 = vpop.f32.mrb[8].mxu0 }
 0x2fa   :  { %v290_v30 = vadd.f32 %v395_v28, %v289_v29  ;;  %v438_v31 = vpop.f32.mrb[9].mxu0 }
 0x2fb   :  { %v292_v32 = vpop.f32.mrb[10].mxu0 }
 0x2fc   :  { %474 = vtanh.f32 %v290_v30  ;;  %v439_v33 = vpop.f32.mrb[11].mxu0 }
 0x306   :  { %v475_v34 = vpop.eup %474 }
 0x307   :  { %v296_v35 = vpack.c.bf16 %v475_v34, %v475_v34 }
 0x309   :  { %449 = vmatmul.mubr.msk.bf16.vlgmr.msra.gmra.mrb[0].mxu1 %vm336_vm3, %v296_v35 }
 0x3dc   :  { %v374_v37 = vpop.f32.mrb[0].mxu1 }
 0x3dd   :  { %v375_v38 = vadd.f32 %v399_v36, %v374_v37  ;;  %v450_v39 = vpop.f32.mrb[1].mxu1 }
 0x3de   :  { %v377_v40 = vpop.f32.mrb[2].mxu1 }
 0x3df   :  { %380 = vst [vmem:[%s760_s9] sm:$0xff] %v375_v38  ;;  %v451_v41 = vpop.f32.mrb[3].mxu1 }
 0x3e0   :  { %385 = vsyncpa [#allocation3], 1 }
 0x3e1   :  { %386 = vsyncpa [#allocation5], 1 }
 0x3e2   :  { %387 = vsyncpa [#allocation8], 1 }

</bundles_post_ra>
